<compile_context>
chip_gen: v5e
topology: v5e:2x2
jax: 0.10.0
libtpu: 0.0.40
codegen_flags: <defaults>
</compile_context>

<pallas_src>
import jax
import jax.numpy as jnp
from jax.experimental import pallas as pl
from jax.experimental.pallas import tpu as pltpu


NP = 128  # packed output lane width (one full lane group)


def _round_up(n, m):
    return ((n + m - 1) // m) * m


def _pack_params(params, compute_dtype):
    """Host-side (tiny, one-time) param transform: fuse fc3->fc4, pad H to 128,
    and pack [W34 | W3] lane-dense so the kernel does exactly two matmuls."""
    w1, b1, w3, b3, w4, b4 = params
    D, H = w1.shape                     # (768, 50)
    I = w3.shape[1]                     # 2
    C = w4.shape[1]                     # num_classes
    assert C + I <= NP, "num_classes + 2 must fit in 128 lanes"

    Hp = NP                             # pad hidden dim to a full lane group
    w1_p = jnp.zeros((D, Hp), jnp.float32).at[:, :H].set(w1.astype(jnp.float32))
    b1_p = jnp.zeros((1, Hp), jnp.float32).at[:, :H].set(b1.astype(jnp.float32))

    # logits = relu(h) @ (w3 @ w4) + (b3 @ w4 + b4) ; inter = relu(h) @ w3 + b3
    w34 = (w3 @ w4).astype(jnp.float32)           # (H, C)
    b34 = (b3 @ w4 + b4).astype(jnp.float32)      # (1, C)
    w_pack = jnp.zeros((Hp, NP), jnp.float32)
    w_pack = w_pack.at[:H, :C].set(w34).at[:H, C:C + I].set(w3.astype(jnp.float32))
    b_pack = jnp.zeros((1, NP), jnp.float32)
    b_pack = b_pack.at[:, :C].set(b34).at[:, C:C + I].set(b3.astype(jnp.float32))

    return w1_p.astype(compute_dtype), b1_p, w_pack, b_pack, C, I


def floko_forward_packed(x, params, *, tile_b=1024,
                         compute_dtype=jnp.bfloat16, out_dtype=jnp.float32):
    """x: (B, 768).  Returns (packed (B, 128) [sigmoid(logits)|inter|0], C, I).

    Traffic-optimal entry point: no padding, no post-kernel slices."""
    B, D = x.shape
    w1_p, b1_p, w_pack, b_pack, C, I = _pack_params(params, compute_dtype)
    Hp = w1_p.shape[1]

    # ---- batch tiling: big tiles (mem-bound), but keep work for both v7x TCs ----
    sub = 16 if jnp.dtype(x.dtype).itemsize < 4 else 8
    Bq = _round_up(B, sub)
    tile_b = max(sub, min(_round_up(int(tile_b), sub), Bq))
    if Bq >= 2 * 256:                                   # >=2 steps, tiles >=256
        tile_b = min(tile_b, _round_up(pl.cdiv(Bq, 2), sub))
    if Bq >= 4 * 512:                                   # >=4 steps, tiles >=512
        tile_b = min(tile_b, _round_up(pl.cdiv(Bq, 4), sub))

    grid = (pl.cdiv(B, tile_b),)        # last partial block handled by masked I/O

    def kernel(x_ref, w1_ref, b1_ref, wp_ref, bp_ref, out_ref):
        # fc + ReLU: in-VMEM cast to the MXU dtype (free), f32 accumulate.
        xb = x_ref[...].astype(compute_dtype)
        h = jnp.dot(xb, w1_ref[...], preferred_element_type=jnp.float32)
        h = jnp.maximum(h + b1_ref[...], 0.0)
        # One fused matmul producing [logits | inter | zero-pad] in 128 lanes.
        packed = jnp.dot(h, wp_ref[...], preferred_element_type=jnp.float32)
        packed = packed + bp_ref[...]
        # Sigmoid only on the logit lanes; intermediate lanes pass through.
        lane = jax.lax.broadcasted_iota(jnp.int32, (1, NP), 1)
        out_ref[...] = jnp.where(lane < C, jax.nn.sigmoid(packed),
                                 packed).astype(out_ref.dtype)

    packed_out = pl.pallas_call(
        kernel,
        out_shape=jax.ShapeDtypeStruct((B, NP), out_dtype),
        grid_spec=pltpu.PrefetchScalarGridSpec(
            num_scalar_prefetch=0,
            grid=grid,
            in_specs=[
                pl.BlockSpec((tile_b, D), lambda i: (i, 0)),   # x tile (streamed)
                pl.BlockSpec((D, Hp), lambda i: (0, 0)),       # w1 padded (resident)
                pl.BlockSpec((1, Hp), lambda i: (0, 0)),       # b1 padded
                pl.BlockSpec((Hp, NP), lambda i: (0, 0)),      # packed [w34 | w3]
                pl.BlockSpec((1, NP), lambda i: (0, 0)),       # packed [b34 | b3]
            ],
            out_specs=pl.BlockSpec((tile_b, NP), lambda i: (i, 0)),
        ),
        compiler_params=pltpu.CompilerParams(
            dimension_semantics=("parallel",)),                # megacore / dual-TC
    )(x, w1_p, b1_p, w_pack, b_pack)

    return packed_out, C, I


def floko_forward(x, params, **kwargs):
    """Module-semantics wrapper: returns (sigmoid_out (B, C), intermediate (B, 2)).

    The two lane slices below are the only post-kernel XLA ops; bandwidth-critical
    consumers should call floko_forward_packed and slice lazily instead."""
    packed, C, I = floko_forward_packed(x, params, **kwargs)
    return packed[:, :C], packed[:, C:C + I]


def init_params(key, num_classes):
    """Deterministic PyTorch-style uniform(-1/sqrt(fan_in), 1/sqrt(fan_in)) init."""
    def linear(k, fan_in, fan_out):
        kw, kb = jax.random.split(k)
        bound = 1.0 / jnp.sqrt(fan_in)
        w = jax.random.uniform(kw, (fan_in, fan_out), jnp.float32, -bound, bound)
        b = jax.random.uniform(kb, (1, fan_out), jnp.float32, -bound, bound)
        return w, b

    k1, k3, k4 = jax.random.split(key, 3)
    w1, b1 = linear(k1, 768, 50)
    w3, b3 = linear(k3, 50, 2)
    w4, b4 = linear(k4, 2, num_classes)
    return (w1, b1, w3, b3, w4, b4)


def floko_ref(x, params, input_dtype=jnp.float32):
    """Pure-JAX reference (unfused). input_dtype mimics the kernel's compute cast."""
    w1, b1, w3, b3, w4, b4 = params
    xc = x.astype(input_dtype).astype(jnp.float32)
    w1c = w1.astype(input_dtype).astype(jnp.float32)
    h = jnp.maximum(xc @ w1c + b1, 0.0)
    inter = h @ w3 + b3
    out = jax.nn.sigmoid(inter @ w4 + b4)
    return out, inter


if __name__ == "__main__":
    key = jax.random.PRNGKey(0)
    kx, kp = jax.random.split(key)

    B = 40                     # deliberately NOT a multiple of tile_b (partial block)
    NUM_CLASSES = 10           # = torch.stack(class_ids).max() + 1 (synthetic)

    x = jax.random.normal(kx, (B, 768), dtype=jnp.float32)
    params = init_params(kp, NUM_CLASSES)
    r_out, r_inter = floko_ref(x, params)

    # 1) strict f32 compute path, small tiles -> 3 grid steps, last block partial.
    out32, inter32 = floko_forward(x, params, tile_b=16, compute_dtype=jnp.float32)
    out32 = jax.block_until_ready(out32)
    inter32 = jax.block_until_ready(inter32)
    assert out32.shape == (B, NUM_CLASSES) and inter32.shape == (B, 2)
    assert jnp.allclose(out32, r_out, atol=1e-5, rtol=1e-5)
    assert jnp.allclose(inter32, r_inter, atol=1e-5, rtol=1e-5)

    # 2) default path: f32 x streamed from HBM, cast to bf16 in-kernel for the MXU.
    out_bf, inter_bf = floko_forward(x, params)
    out_bf = jax.block_until_ready(out_bf)
    inter_bf = jax.block_until_ready(inter_bf)
    rb_out, rb_inter = floko_ref(x, params, input_dtype=jnp.bfloat16)
    assert out_bf.shape == (B, NUM_CLASSES) and inter_bf.shape == (B, 2)
    assert jnp.allclose(out_bf, rb_out, atol=1e-4, rtol=1e-4)
    assert jnp.allclose(inter_bf, rb_inter, atol=1e-4, rtol=1e-4)
    assert jnp.allclose(out_bf, r_out, atol=5e-2, rtol=5e-2)

    # 3) packed (traffic-optimal) entry point: lane layout is [sigmoid|inter|zeros].
    packed, C, I = floko_forward_packed(x, params)
    packed = jax.block_until_ready(packed)
    assert packed.shape == (B, NP)
    assert jnp.allclose(packed[:, :C], out_bf)
    assert jnp.allclose(packed[:, C:C + I], inter_bf)
    assert jnp.all(packed[:, C + I:] == 0.0)

    print("KERNEL_OK")
</pallas_src>

<mosaic_0001>
module attributes {stable_mosaic.version = 11 : i64} {
  func.func @kernel(%arg0: i32, %arg1: memref<16x768xf32, #tpu.memory_space<vmem>>, %arg2: memref<768x128xf32, #tpu.memory_space<vmem>>, %arg3: memref<1x128xf32, #tpu.memory_space<vmem>>, %arg4: memref<128x128xf32, #tpu.memory_space<vmem>>, %arg5: memref<1x128xf32, #tpu.memory_space<vmem>>, %arg6: memref<16x128xf32, #tpu.memory_space<vmem>>) attributes {dimension_semantics = [#tpu.dimension_semantics<parallel>], iteration_bounds = array<i64: 3>, scalar_prefetch = 0 : i64, scratch_operands = 0 : i64, tpu.core_type = #tpu.core_type<tc>, window_params = [{transform_indices = @transform_0, window_bounds = array<i64: 16, 768>}, {pipeline_mode = #tpu.pipeline_mode<synchronous>, transform_indices = @transform_1, window_bounds = array<i64: 768, 128>}, {pipeline_mode = #tpu.pipeline_mode<synchronous>, transform_indices = @transform_2, window_bounds = array<i64: 1, 128>}, {pipeline_mode = #tpu.pipeline_mode<synchronous>, transform_indices = @transform_3, window_bounds = array<i64: 128, 128>}, {pipeline_mode = #tpu.pipeline_mode<synchronous>, transform_indices = @transform_4, window_bounds = array<i64: 1, 128>}, {transform_indices = @transform_5, window_bounds = array<i64: 16, 128>}]} {
    %c0 = arith.constant 0 : index
    %c0_0 = arith.constant 0 : index
    %0 = vector.load %arg1[%c0, %c0_0] : memref<16x768xf32, #tpu.memory_space<vmem>>, vector<16x768xf32>
    %c0_1 = arith.constant 0 : index
    %c0_2 = arith.constant 0 : index
    %1 = vector.load %arg2[%c0_1, %c0_2] : memref<768x128xf32, #tpu.memory_space<vmem>>, vector<768x128xf32>
    %cst = arith.constant dense<0.000000e+00> : vector<16x128xf32>
    %2 = tpu.matmul %0, %1, %cst {dimension_numbers = #tpu.dot_dimension_numbers<[1], [0], [0], [1], [0, 0, 1, 1], [], []>} : vector<16x768xf32>, vector<768x128xf32>, vector<16x128xf32> -> vector<16x128xf32>
    %c0_3 = arith.constant 0 : index
    %c0_4 = arith.constant 0 : index
    %3 = vector.load %arg3[%c0_3, %c0_4] : memref<1x128xf32, #tpu.memory_space<vmem>>, vector<1x128xf32>
    %4 = vector.broadcast %3 : vector<1x128xf32> to vector<16x128xf32>
    %5 = arith.addf %2, %4 : vector<16x128xf32>
    %cst_5 = arith.constant 0.000000e+00 : f32
    %6 = vector.broadcast %cst_5 : f32 to vector<16x128xf32>
    %7 = arith.maximumf %5, %6 : vector<16x128xf32>
    %c0_6 = arith.constant 0 : index
    %c0_7 = arith.constant 0 : index
    %8 = vector.load %arg4[%c0_6, %c0_7] : memref<128x128xf32, #tpu.memory_space<vmem>>, vector<128x128xf32>
    %cst_8 = arith.constant dense<0.000000e+00> : vector<16x128xf32>
    %9 = tpu.matmul %7, %8, %cst_8 {dimension_numbers = #tpu.dot_dimension_numbers<[1], [0], [0], [1], [0, 0, 1, 1], [], []>} : vector<16x128xf32>, vector<128x128xf32>, vector<16x128xf32> -> vector<16x128xf32>
    %c0_9 = arith.constant 0 : index
    %c0_10 = arith.constant 0 : index
    %10 = vector.load %arg5[%c0_9, %c0_10] : memref<1x128xf32, #tpu.memory_space<vmem>>, vector<1x128xf32>
    %11 = vector.broadcast %10 : vector<1x128xf32> to vector<16x128xf32>
    %12 = arith.addf %9, %11 : vector<16x128xf32>
    %13 = tpu.iota {dimensions = array<i32: 1>} : vector<1x128xi32>
    %c10_i32 = arith.constant 10 : i32
    %14 = vector.broadcast %c10_i32 : i32 to vector<1x128xi32>
    %15 = arith.cmpi slt, %13, %14 : vector<1x128xi32>
    %16 = arith.negf %12 : vector<16x128xf32>
    %17 = math.exp %16 : vector<16x128xf32>
    %cst_11 = arith.constant 1.000000e+00 : f32
    %18 = vector.broadcast %cst_11 : f32 to vector<16x128xf32>
    %19 = arith.addf %18, %17 : vector<16x128xf32>
    %20 = arith.divf %18, %19 : vector<16x128xf32>
    %21 = vector.shape_cast %15 : vector<1x128xi1> to vector<1x128xi1>
    %22 = vector.broadcast %21 : vector<1x128xi1> to vector<16x128xi1>
    %23 = arith.select %22, %20, %12 : vector<16x128xi1>, vector<16x128xf32>
    %c0_12 = arith.constant 0 : index
    %c0_13 = arith.constant 0 : index
    %24 = vector.load %arg6[%c0_12, %c0_13] : memref<16x128xf32, #tpu.memory_space<vmem>>, vector<16x128xf32>
    tpu.vector_store %arg6[%c0_12, %c0_13], %23 {strides = array<i32>} : memref<16x128xf32, #tpu.memory_space<vmem>>, vector<16x128xf32>,
    return
  }
  func.func @transform_0(%arg0: i32) -> (i32, i32) {
    %c0_i32 = arith.constant 0 : i32
    %c0_i32_0 = arith.constant 0 : i32
    return %arg0, %c0_i32 : i32, i32
  }
  func.func @transform_1(%arg0: i32) -> (i32, i32) {
    %c0_i32 = arith.constant 0 : i32
    %c0_i32_0 = arith.constant 0 : i32
    %c0_i32_1 = arith.constant 0 : i32
    return %c0_i32, %c0_i32_0 : i32, i32
  }
  func.func @transform_2(%arg0: i32) -> (i32, i32) {
    %c0_i32 = arith.constant 0 : i32
    %c0_i32_0 = arith.constant 0 : i32
    %c0_i32_1 = arith.constant 0 : i32
    return %c0_i32, %c0_i32_0 : i32, i32
  }
  func.func @transform_3(%arg0: i32) -> (i32, i32) {
    %c0_i32 = arith.constant 0 : i32
    %c0_i32_0 = arith.constant 0 : i32
    %c0_i32_1 = arith.constant 0 : i32
    return %c0_i32, %c0_i32_0 : i32, i32
  }
  func.func @transform_4(%arg0: i32) -> (i32, i32) {
    %c0_i32 = arith.constant 0 : i32
    %c0_i32_0 = arith.constant 0 : i32
    %c0_i32_1 = arith.constant 0 : i32
    return %c0_i32, %c0_i32_0 : i32, i32
  }
  func.func @transform_5(%arg0: i32) -> (i32, i32) {
    %c0_i32 = arith.constant 0 : i32
    %c0_i32_0 = arith.constant 0 : i32
    return %arg0, %c0_i32 : i32, i32
  }
}

</mosaic_0001>

<bundles_post_ra>
// kernel: tpu_custom_call.1
= control target key start
LH: loop header
LB: loop body
LE: loop exit
PB: predicated region body
PF: predicated region fallthrough
CT: control target
= control target key end

     0   :  { %s1323_s0 = inlined_call_operand.hbm [shape: f32[40,768], index: 0, kind: input, shape index: {}]   ;;  %s1324_s1 = inlined_call_operand.hbm [shape: f32[768,128], index: 1, kind: input, shape index: {}]   ;;  %s1325_s2 = inlined_call_operand.vmem [shape: f32[1,128], index: 2, kind: input, shape index: {}]   ;;  %s1326_s3 = inlined_call_operand.hbm [shape: f32[128,128], index: 3, kind: input, shape index: {}]   ;;  %s1327_s4 = inlined_call_operand.vmem [shape: f32[1,128], index: 4, kind: input, shape index: {}]   ;;  %s1328_s5 = inlined_call_operand.hbm [shape: f32[40,128], index: 5, kind: output, shape index: {}]  }
   0x1   :  { %1332 = sst [smem:[#allocation13_spill]] %s1324_s1 }
   0x2   :  { %1333 = sst [smem:[#allocation14_spill]] %s1326_s3 }
   0x3   :  { %10 = vsyncpa [#allocation3], 0 }
   0x4   :  { %12 = vsyncpa [#allocation3 + $0x1], 0 }
   0x5   :  { %13 = vsyncpa [#allocation6], 0 }
   0x6   :  { %14 = vsyncpa [#allocation4], 0 }
   0x7   :  { %16 = vsyncpa [#allocation4 + $0x1], 0  ;;  %s1100_s18 = smov 0   ;;  %s1102_s19 = smov 0  }
   0x8   :  { %s1104_s20 = smov 0   ;;  %s1106_s21 = smov 0  }
   0x9 LB: > { %s1121_s22 = sadd.s32 4294967295, %s1058_s21   ;;  %s755_s23 = sadd.s32 4294967294, %s1058_s21   ;;  %s1058_s21 = sphi %s1106_s21, %s1352_s21   ;;  %s1054_s20 = sphi %s1104_s20, %s1351_s20   ;;  %s1050_s19 = sphi %s1102_s19, %s1350_s19   ;;  %s1046_s18 = sphi %s1100_s18, %s1349_s18  }
   0xa   : > { %s1125_s24 = sadd.s32 1, %s1058_s21   ;;  %s29_s25 = sadd.s32 1, %s1054_s20 }
   0xb   : > { %s26_s26 = ssub.s32 %s1058_s21, %s1125_s24  ;;  %p36_p0 = scmp.ne.s32.totalorder %s1054_s20, %s1050_s19 }
   0xc   : > { %p27_p1 = scmp.eq.s32.totalorder %s26_s26, 0  ;;  %p37_p2 = scmp.eq.s32.totalorder %s1058_s21, 0 }
   0xd   : > { %p42_p3 = scmp.ne.s32.totalorder %s1050_s19, %s1046_s18  ;;  %p1331_p4 = scmp.eq.s32.totalorder %s1121_s22, 0 }
   0xe   : > { %s1137_s27 = scalar_select %p27_p1, %s1054_s20, %s29_s25  }
   0xf   : > { %p1139_p5 = por %p37_p2, %p36_p0  ;;  %p1145_p6 = por %p1331_p4, %p42_p3 }
  0x10   : > { %p150_p7 = scmp.eq.s32.totalorder %s1121_s22, 2  ;;  %p156_p8 = scmp.eq.s32.totalorder %s755_s23, 2 }
  0x11   : > { %p756_p9 = scmp.ge.s32.totalorder %s1058_s21, 1  ;;  %p163_p10 = scmp.lt.s32.totalorder %s1058_s21, 4 }
  0x12   : > { %p1152_p11 = por %p150_p7, %p36_p0  ;;  %p1156_p12 = por %p156_p8, %p42_p3 }
  0x13   : > { %p1160_p13 = pnand %p756_p9, %p163_p10  ;;  %s1339_s1 = sld [smem:[#allocation13_spill]] }
  0x14   : > { %s1337_s6 = scalar_select %p1156_p12, 1, 0 }
  0x15   : > { %p812_p1 = pneg %p1160_p13  ;;  %s1060_s11 = smov [#allocation5]  }
  0x16   : > { %s176_s12 = sshll.u32 %s1060_s11, 4  ;;  %s1340_s3 = sld [smem:[#allocation14_spill]]  ;;  %s177_s12 = int_to_ptr.vmem [resolvable:$true] %s176_s12 }
  0x17   : > { %p813_p0 = pnand %p812_p1, %p1331_p4  ;;  %s1061_s16 = smov 128  }
  0x18   : > { %s1062_s17 = smov 8   ;;  %s1063_s23 = smov [#allocation7]  }
  0x19   : > { %s174_s10 = sshll.u32 %s1339_s1, 4  ;;  %s193_s25 = sshll.u32 %s1063_s23, 4  ;;  %s175_s10 = int_to_ptr.hbm [resolvable:$true] %s174_s10  ;;  %s194_s25 = int_to_ptr.vmem [resolvable:$true] %s193_s25 }
  0x1a   : > { %815 = dma.hbm_to_vmem [thread:$0]  (!%p813_p0), %s175_s10, 12288, %s177_s12, [#allocation6], %s1061_s16, %s1061_s16, %s1062_s17  }
  0x1b   : > { %p759_p2 = scmp.ge.s32.totalorder %s1058_s21, 3 }
  0x1c   : > { %s191_s15 = sshll.u32 %s1340_s3, 4  ;;  %s192_s15 = int_to_ptr.hbm [resolvable:$true] %s191_s15 }
  0x1d   : > { %818 = dma.hbm_to_vmem [thread:$0]  (!%p813_p0), %s192_s15, 2048, %s194_s25, [#allocation6], %s1061_s16, %s1061_s16, %s1062_s17  }
  0x1e   : > { %206 = sbr.rel (%p759_p2) target bundleno = 87 (0x57), region = 32 }
  0x23   : > { %209 = sbr.rel (!%p1139_p5) target bundleno = 87 (0x57), region = 36 }
  0x28   : > { %s210_s26 = sand.u32 1, %s1054_s20   ;;  %s760_s8 = sshll.u32 %s1058_s21, 1 }
  0x29   : > { %s799_s9 = smul.u32 96, %s210_s26  ;;  %s216_s11 = ssub.s32 5, %s760_s8 }
  0x2a   : > { %p217_p3 = scmp.lt.s32.totalorder %s216_s11, 2  ;;  %s1179_s14 = scalar_lea.sflag [#allocation3], %s210_s26 }
  0x2b   : > { %s214_s15 = scalar_lea.vmem [#allocation2], %s799_s9 }
  0x2c   : > { %s1354_s11 = smov (!%p217_p3, %s216_s11), 2 }
  0x2d   : > { %s762_s10 = smul.u32 48, %s1354_s11 }
  0x2f   : > { %s221_s12 = ssub.s32 96, %s762_s10 }
  0x30   : > { %s222_s13 = sshll.u32 %s221_s12, 4 }
  0x31   : > { %223 = vsyncadd %s1179_s14, %s222_s13  ;;  %p1182_p7 = scmp.ne.s32.totalorder %s762_s10, 0  ;;  %s800_s16 = smul.u32 96, %s1058_s21 }
  0x32   : > { %s1187_s17 = sshll.u32 %s214_s15, 4  ;;  %s1189_s23 = smul.u32 768, %s1354_s11 }
  0x33   : > { %1342 = sst [smem:[#allocation12_spill]] %s1187_s17  ;;  %s227_s26 = scalar_lea.hbm %s1323_s0, %s800_s16 }
  0x34   : > { %s229_s9 = sshll.u32 %s227_s26, 4  ;;  %s940_s12 = sshrl.u32 %s1189_s23, 4  ;;  %s1195_s9 = int_to_ptr.hbm [resolvable:$true] %s229_s9 }
  0x35   : > { %s938_s10 = sshra.s32 %s1195_s9, 4  ;;  %s976_s13 = sshll.u32 %s940_s12, 4  ;;  %s939_s10 = int_to_ptr.hbm [resolvable:$true] %s938_s10 }
  0x36   : > { %p942_p5 = scmp.ne.s32.totalorder %s976_s13, %s1189_s23  ;;  %s943_s15 = sadd.s32 1, %s940_s12 }
  0x37   : > { %s949_s16 = scalar_lea.hbm %s1323_s0, 240  ;;  %p950_p1 = scmp.lt.s32.totalorder %s939_s10, %s1323_s0 }
  0x38   : > { %s1356_s15 = smov (!%p942_p5, %s943_s15), %s940_s12 }
  0x39   : > { %s945_s11 = scalar_lea.hbm %s939_s10, %s1356_s15 }
  0x3a   : > { %p946_p8 = scmp.ne.s32.totalorder %s939_s10, %s945_s11  ;;  %p951_p0 = scmp.lt.s32.totalorder %s949_s16, %s945_s11 }
  0x3c   : > { %p947_p9 = pnand %p946_p8, %p1182_p7  ;;  %p952_p2 = por %p951_p0, %p950_p1 }
  0x3e   : > { %p948_p10 = pneg %p947_p9 }
  0x40   : > { %p953_p3 = pnand %p952_p2, %p948_p10 }
  0x42   : > { %956 = shalt.err (!%p953_p3)
}
  0x43   : > { %s1343_s13 = sld [smem:[#allocation12_spill]]  ;;  %s1064_s25 = smov [#allocation2]  }
  0x44   : > { %s968_s8 = scalar_lea.vmem %s1064_s25, 192 }
  0x49   : > { %s1344_s1 = int_to_ptr.vmem [resolvable:$true] %s1343_s13 }
  0x4a   : > { %s957_s12 = sshra.s32 %s1344_s1, 4  ;;  %s958_s12 = int_to_ptr.vmem [resolvable:$true] %s957_s12 }
  0x4b   : > { %s964_s3 = scalar_lea.vmem %s958_s12, %s1356_s15 }
  0x4c   : > { %p965_p5 = scmp.ne.s32.totalorder %s958_s12, %s964_s3  ;;  %p970_p4 = scmp.lt.s32.totalorder %s968_s8, %s964_s3 }
  0x4e   : > { %p966_p8 = pnand %p965_p5, %p1182_p7 }
  0x50   : > { %p967_p9 = pneg %p966_p8 }
  0x52   : > { %p972_p12 = pnand %p970_p4, %p967_p9 }
  0x54   : > { %975 = shalt.err (!%p972_p12)
}
  0x55   : > { %s1065_s17 = smov 768   ;;  %s1066_s10 = smov 48  }
  0x56   : > { %237 = dma.hbm_to_vmem [thread:$0]  (%p1182_p7), %s1195_s9, %s1189_s23, %s1344_s1, %s1179_s14, %s1065_s17, %s1065_s17, %s1066_s10  }
  0x57 PF: > { %243 = sbr.rel (%p1160_p13) target bundleno = 497 (0x1f1), region = 40  ;;  %s1222_s3 = sand.u32 (!%p1160_p13), 1, %s1050_s19  }
  0x58   : > { %s801_s15 = smul.u32 (!%p1160_p13), 96, %s1222_s3  ;;  %s246_s11 = scalar_lea.sflag (!%p1160_p13), [#allocation3], %s1222_s3 }
  0x5a   : > { %s1226_s16 = scalar_lea.vmem (!%p1160_p13), [#allocation2], %s801_s15 }
  0x5c   : > { %1033 = dma.done.wait (%p1145_p6), %s246_s11, 1536  }
  0x5d   : > { %1035 = vsyncadd (%p1145_p6), %s246_s11, 4294965760  ;;  %p1345_p4 = scmp.eq.s32.totalorder %s1121_s22, 0 }
  0x5f   : > { %1037 = dma.done.wait (%p1345_p4), [#allocation6], 14336   ;;  %p1346_p12 = pmov %p1345_p4 }
  0x60   : > { %v325_v0 = vld [vmem:[#allocation5 + $0x78] sm:$0xff]  ;;  %v324_v3 = vld [vmem:[#allocation5 + $0x70] sm:$0xff]  ;;  %v323_v6 = vld [vmem:[#allocation5 + $0x68] sm:$0xff]  ;;  %s770_s23 = sshll.u32 %s1222_s3, 4  ;;  %s641_s26 = scalar_lea.sflag [#allocation4], %s1222_s3 }
  0x61   : > { %1039 = vsyncadd (%p1346_p12), [#allocation6], 4294952960  ;;  %v341_v1 = vld [vmem:[#allocation5 + $0xf8] sm:$0xff]  ;;  %410 = vmatpush.msra.mxu0 %v325_v0  ;;  %v340_v4 = vld [vmem:[#allocation5 + $0xf0] sm:$0xff]  ;;  %s1256_s9 = scalar_lea.vmem [#allocation8], %s770_s23  ;;  %s774_s13 = sshll.u32 (%p1152_p11), %s1121_s22, 1 }
  0x62   : > { %v373_v2 = vld [vmem:[#allocation5 + $0x1f8] sm:$0xff]  ;;  %433 = vmatpush.msra.mxu1 %v341_v1  ;;  %v372_v5 = vld [vmem:[#allocation5 + $0x1f0] sm:$0xff]  ;;  %v339_v7 = vld [vmem:[#allocation5 + $0xe8] sm:$0xff]  ;;  %s649_s12 = ssub.s32 (%p1152_p11), 5, %s774_s13 }
  0x63   : > { %479 = vmatpush.msra.mxu3 %v373_v2  ;;  %411 = vmatpush.msra.mxu0 %v324_v3  ;;  %v371_v8 = vld [vmem:[#allocation5 + $0x1e8] sm:$0xff]  ;;  %v322_v9 = vld [vmem:[#allocation5 + $0x60] sm:$0xff]  ;;  %v321_v12 = vld [vmem:[#allocation5 + $0x58] sm:$0xff]  ;;  %p650_p6 = scmp.lt.s32.totalorder (%p1152_p11), %s649_s12, 2 }
  0x64   : > { %434 = vmatpush.msra.mxu1 %v340_v4  ;;  %v338_v10 = vld [vmem:[#allocation5 + $0xe0] sm:$0xff]  ;;  %v337_v13 = vld [vmem:[#allocation5 + $0xd8] sm:$0xff]  ;;  %v320_v16 = vld [vmem:[#allocation5 + $0x50] sm:$0xff] }
  0x65   : > { %480 = vmatpush.msra.mxu3 %v372_v5  ;;  %412 = vmatpush.msra.mxu0 %v323_v6  ;;  %v370_v11 = vld [vmem:[#allocation5 + $0x1e0] sm:$0xff]  ;;  %v369_v14 = vld [vmem:[#allocation5 + $0x1d8] sm:$0xff]  ;;  %v336_v17 = vld [vmem:[#allocation5 + $0xd0] sm:$0xff] }
  0x66   : > { %435 = vmatpush.msra.mxu1 %v339_v7  ;;  %v357_v15 = vld [vmem:[#allocation5 + $0x178] sm:$0xff]  ;;  %v356_v18 = vld [vmem:[#allocation5 + $0x170] sm:$0xff]  ;;  %v355_v20 = vld [vmem:[#allocation5 + $0x168] sm:$0xff] }
  0x67   : > { %481 = vmatpush.msra.mxu3 %v371_v8  ;;  %413 = vmatpush.msra.mxu0 %v322_v9  ;;  %v368_v19 = vld [vmem:[#allocation5 + $0x1d0] sm:$0xff]  ;;  %v319_v21 = vld [vmem:[#allocation5 + $0x48] sm:$0xff]  ;;  %v354_v24 = vld [vmem:[#allocation5 + $0x160] sm:$0xff] }
  0x68   : > { %436 = vmatpush.msra.mxu1 %v338_v10  ;;  %456 = vmatpush.msra.mxu2 %v357_v15  ;;  %v335_v22 = vld [vmem:[#allocation5 + $0xc8] sm:$0xff]  ;;  %v318_v25 = vld [vmem:[#allocation5 + $0x40] sm:$0xff]  ;;  %v353_v28 = vld [vmem:[#allocation5 + $0x158] sm:$0xff] }
  0x69   : > { %482 = vmatpush.msra.mxu3 %v370_v11  ;;  %414 = vmatpush.msra.mxu0 %v321_v12  ;;  %v367_v23 = vld [vmem:[#allocation5 + $0x1c8] sm:$0xff]  ;;  %v334_v26 = vld [vmem:[#allocation5 + $0xc0] sm:$0xff]  ;;  %v317_v29 = vld [vmem:[#allocation5 + $0x38] sm:$0xff] }
  0x6a   : > { %437 = vmatpush.msra.mxu1 %v337_v13  ;;  %457 = vmatpush.msra.mxu2 %v356_v18  ;;  %v366_v27 = vld [vmem:[#allocation5 + $0x1c0] sm:$0xff]  ;;  %v333_v30 = vld [vmem:[#allocation5 + $0xb8] sm:$0xff]  ;;  %v352_v32 = vld [vmem:[#allocation5 + $0x150] sm:$0xff] }
  0x6b   : > { %483 = vmatpush.msra.mxu3 %v369_v14  ;;  %415 = vmatpush.msra.mxu0 %v320_v16  ;;  %v365_v31 = vld [vmem:[#allocation5 + $0x1b8] sm:$0xff]  ;;  %v316_v33 = vld [vmem:[#allocation5 + $0x30] sm:$0xff]  ;;  %v351_v36 = vld [vmem:[#allocation5 + $0x148] sm:$0xff] }
  0x6c   : > { %438 = vmatpush.msra.mxu1 %v336_v17  ;;  %458 = vmatpush.msra.mxu2 %v355_v20  ;;  %v332_v34 = vld [vmem:[#allocation5 + $0xb0] sm:$0xff]  ;;  %v315_v37 = vld [vmem:[#allocation5 + $0x28] sm:$0xff]  ;;  %v350_v40 = vld [vmem:[#allocation5 + $0x140] sm:$0xff] }
  0x6d   : > { %484 = vmatpush.msra.mxu3 %v368_v19  ;;  %416 = vmatpush.msra.mxu0 %v319_v21  ;;  %v364_v35 = vld [vmem:[#allocation5 + $0x1b0] sm:$0xff]  ;;  %v331_v38 = vld [vmem:[#allocation5 + $0xa8] sm:$0xff]  ;;  %v314_v41 = vld [vmem:[#allocation5 + $0x20] sm:$0xff] }
  0x6e   : > { %439 = vmatpush.msra.mxu1 %v335_v22  ;;  %459 = vmatpush.msra.mxu2 %v354_v24  ;;  %v363_v39 = vld [vmem:[#allocation5 + $0x1a8] sm:$0xff]  ;;  %v330_v42 = vld [vmem:[#allocation5 + $0xa0] sm:$0xff]  ;;  %v349_v44 = vld [vmem:[#allocation5 + $0x138] sm:$0xff] }
  0x6f   : > { %485 = vmatpush.msra.mxu3 %v367_v23  ;;  %417 = vmatpush.msra.mxu0 %v318_v25  ;;  %v362_v43 = vld [vmem:[#allocation5 + $0x1a0] sm:$0xff]  ;;  %v313_v45 = vld [vmem:[#allocation5 + $0x18] sm:$0xff]  ;;  %v348_v48 = vld [vmem:[#allocation5 + $0x130] sm:$0xff] }
  0x70   : > { %440 = vmatpush.msra.mxu1 %v334_v26  ;;  %460 = vmatpush.msra.mxu2 %v353_v28  ;;  %v329_v46 = vld [vmem:[#allocation5 + $0x98] sm:$0xff]  ;;  %v312_v49 = vld [vmem:[#allocation5 + $0x10] sm:$0xff]  ;;  %v347_v52 = vld [vmem:[#allocation5 + $0x128] sm:$0xff] }
  0x71   : > { %486 = vmatpush.msra.mxu3 %v366_v27  ;;  %418 = vmatpush.msra.mxu0 %v317_v29  ;;  %v361_v47 = vld [vmem:[#allocation5 + $0x198] sm:$0xff]  ;;  %v328_v50 = vld [vmem:[#allocation5 + $0x90] sm:$0xff]  ;;  %v311_v53 = vld [vmem:[#allocation5 + $0x8] sm:$0xff] }
  0x72   : > { %441 = vmatpush.msra.mxu1 %v333_v30  ;;  %461 = vmatpush.msra.mxu2 %v352_v32  ;;  %v360_v51 = vld [vmem:[#allocation5 + $0x190] sm:$0xff]  ;;  %v327_v54 = vld [vmem:[#allocation5 + $0x88] sm:$0xff]  ;;  %v346_v56 = vld [vmem:[#allocation5 + $0x120] sm:$0xff] }
  0x73   : > { %487 = vmatpush.msra.mxu3 %v365_v31  ;;  %419 = vmatpush.msra.mxu0 %v316_v33  ;;  %v359_v55 = vld [vmem:[#allocation5 + $0x188] sm:$0xff]  ;;  %v310_v57 = vld [vmem:[#allocation5] sm:$0xff]  ;;  %v389_v60 = vld [vmem:[#allocation5 + $0x278] sm:$0xff] }
  0x74   : > { %442 = vmatpush.msra.mxu1 %v332_v34  ;;  %462 = vmatpush.msra.mxu2 %v351_v36  ;;  %v326_v58 = vld [vmem:[#allocation5 + $0x80] sm:$0xff]  ;;  %v405_v61 = vld [vmem:[#allocation5 + $0x2f8] sm:$0xff]  ;;  %v388_v62 = vld [vmem:[#allocation5 + $0x270] sm:$0xff] }
  0x75   : > { %488 = vmatpush.msra.mxu3 %v364_v35  ;;  %420 = vmatpush.msra.mxu0 %v315_v37  ;;  %v358_v59 = vld [vmem:[#allocation5 + $0x180] sm:$0xff]  ;;  %v345_v63 = vld [vmem:[#allocation5 + $0x118] sm:$0xff]  ;;  %v404_v0 = vld [vmem:[#allocation5 + $0x2f0] sm:$0xff] }
  0x76   : > { %443 = vmatpush.msra.mxu1 %v331_v38  ;;  %463 = vmatpush.msra.mxu2 %v350_v40  ;;  %v387_v1 = vld [vmem:[#allocation5 + $0x268] sm:$0xff]  ;;  %v344_v2 = vld [vmem:[#allocation5 + $0x110] sm:$0xff]  ;;  %v386_v4 = vld [vmem:[#allocation5 + $0x260] sm:$0xff] }
  0x77   : > { %489 = vmatpush.msra.mxu3 %v363_v39  ;;  %421 = vmatpush.msra.mxu0 %v314_v41  ;;  %v403_v3 = vld [vmem:[#allocation5 + $0x2e8] sm:$0xff]  ;;  %v402_v6 = vld [vmem:[#allocation5 + $0x2e0] sm:$0xff]  ;;  %v385_v7 = vld [vmem:[#allocation5 + $0x258] sm:$0xff] }
  0x78   : > { %444 = vmatpush.msra.mxu1 %v330_v42  ;;  %464 = vmatpush.msra.mxu2 %v349_v44  ;;  %v343_v5 = vld [vmem:[#allocation5 + $0x108] sm:$0xff]  ;;  %v342_v8 = vld [vmem:[#allocation5 + $0x100] sm:$0xff]  ;;  %v401_v9 = vld [vmem:[#allocation5 + $0x2d8] sm:$0xff] }
  0x79   : > { %490 = vmatpush.msra.mxu3 %v362_v43  ;;  %422 = vmatpush.msra.mxu0 %v313_v45  ;;  %v384_v10 = vld [vmem:[#allocation5 + $0x250] sm:$0xff]  ;;  %v383_v13 = vld [vmem:[#allocation5 + $0x248] sm:$0xff]  ;;  %v382_v16 = vld [vmem:[#allocation5 + $0x240] sm:$0xff] }
  0x7a   : > { %445 = vmatpush.msra.mxu1 %v329_v46  ;;  %465 = vmatpush.msra.mxu2 %v348_v48  ;;  %v300_v11 = vld [vmem:[%s1226_s16 + $0x10] sm:$0xff]  ;;  %v299_v14 = vld [vmem:[%s1226_s16 + $0x8] sm:$0xff]  ;;  %v301_v17 = vld [vmem:[%s1226_s16 + $0x18] sm:$0xff] }
  0x7b   : > { %491 = vmatpush.msra.mxu3 %v361_v47  ;;  %423 = vmatpush.msra.mxu0 %v312_v49  ;;  %v400_v12 = vld [vmem:[#allocation5 + $0x2d0] sm:$0xff]  ;;  %v399_v15 = vld [vmem:[#allocation5 + $0x2c8] sm:$0xff]  ;;  %v398_v18 = vld [vmem:[#allocation5 + $0x2c0] sm:$0xff] }
  0x7c   : > { %446 = vmatpush.msra.mxu1 %v328_v50  ;;  %466 = vmatpush.msra.mxu2 %v347_v52  ;;  %v298_v19 = vld [vmem:[%s1226_s16] sm:$0xff]  ;;  %v565_v20 = vld [vmem:[#allocation7 + $0x78] sm:$0xff]  ;;  %v380_v24 = vld [vmem:[#allocation5 + $0x230] sm:$0xff] }
  0x7d   : > { %492 = vmatpush.msra.mxu3 %v360_v51  ;;  %424 = vmatpush.msra.mxu0 %v311_v53  ;;  %v381_v21 = vld [vmem:[#allocation5 + $0x238] sm:$0xff]  ;;  %v306_v23 = vld [vmem:[%s1226_s16 + $0x40] sm:$0xff]  ;;  %v396_v25 = vld [vmem:[#allocation5 + $0x2b0] sm:$0xff] }
  0x7e   : > { %447 = vmatpush.msra.mxu1 %v327_v54  ;;  %467 = vmatpush.msra.mxu2 %v346_v56  ;;  %v397_v22 = vld [vmem:[#allocation5 + $0x2b8] sm:$0xff]  ;;  %v564_v26 = vld [vmem:[#allocation7 + $0x70] sm:$0xff]  ;;  %v379_v27 = vld [vmem:[#allocation5 + $0x228] sm:$0xff] }
  0x7f   : > { %493 = vmatpush.msra.mxu3 %v359_v55  ;;  %425 = vmatpush.msra.mxu0 %v310_v57  ;;  %v395_v28 = vld [vmem:[#allocation5 + $0x2a8] sm:$0xff]  ;;  %v378_v30 = vld [vmem:[#allocation5 + $0x220] sm:$0xff]  ;;  %v304_v32 = vld [vmem:[%s1226_s16 + $0x30] sm:$0xff] }
  0x80   : > { %448 = vmatpush.msra.mxu1 %v326_v58  ;;  %468 = vmatpush.msra.mxu2 %v345_v63  ;;  %v307_v29 = vld [vmem:[%s1226_s16 + $0x48] sm:$0xff]  ;;  %v394_v31 = vld [vmem:[#allocation5 + $0x2a0] sm:$0xff]  ;;  %v305_v33 = vld [vmem:[%s1226_s16 + $0x38] sm:$0xff] }
  0x81   : > { %494 = vmatpush.msra.mxu3 %v358_v59  ;;  %502 = vmatpush.msrb.mxu0 %v389_v60  ;;  %v377_v34 = vld [vmem:[#allocation5 + $0x218] sm:$0xff]  ;;  %v376_v36 = vld [vmem:[#allocation5 + $0x210] sm:$0xff]  ;;  %v563_v37 = vld [vmem:[#allocation7 + $0x68] sm:$0xff] }
  0x82   : > { %525 = vmatpush.msrb.mxu1 %v405_v61  ;;  %469 = vmatpush.msra.mxu2 %v344_v2  ;;  %v393_v35 = vld [vmem:[#allocation5 + $0x298] sm:$0xff]  ;;  %v392_v38 = vld [vmem:[#allocation5 + $0x290] sm:$0xff]  ;;  %v375_v39 = vld [vmem:[#allocation5 + $0x208] sm:$0xff] }
  0x83   : > { %783 = vmatpush.msrb.mxu3 %v389_v60  ;;  %503 = vmatpush.msrb.mxu0 %v388_v62  ;;  %v562_v40 = vld [vmem:[#allocation7 + $0x60] sm:$0xff]  ;;  %v391_v41 = vld [vmem:[#allocation5 + $0x288] sm:$0xff]  ;;  %v308_v45 = vld [vmem:[%s1226_s16 + $0x50] sm:$0xff] }
  0x84   : > { %526 = vmatpush.msrb.mxu1 %v404_v0  ;;  %470 = vmatpush.msra.mxu2 %v343_v5  ;;  %v374_v42 = vld [vmem:[#allocation5 + $0x200] sm:$0xff]  ;;  %v303_v46 = vld [vmem:[%s1226_s16 + $0x28] sm:$0xff]  ;;  %v309_v47 = vld [vmem:[%s1226_s16 + $0x58] sm:$0xff] }
  0x85   : > { %784 = vmatpush.msrb.mxu3 %v388_v62  ;;  %504 = vmatpush.msrb.mxu0 %v387_v1  ;;  %v390_v43 = vld [vmem:[#allocation5 + $0x280] sm:$0xff]  ;;  %v561_v48 = vld [vmem:[#allocation7 + $0x58] sm:$0xff]  ;;  %v560_v49 = vld [vmem:[#allocation7 + $0x50] sm:$0xff] }
  0x86   : > { %527 = vmatpush.msrb.mxu1 %v403_v3  ;;  %471 = vmatpush.msra.mxu2 %v342_v8  ;;  %v302_v44 = vld [vmem:[%s1226_s16 + $0x20] sm:$0xff]  ;;  %v559_v50 = vld [vmem:[#allocation7 + $0x48] sm:$0xff]  ;;  %v557_v52 = vld [vmem:[#allocation7 + $0x38] sm:$0xff] }
  0x87   : > { %785 = vmatpush.msrb.mxu3 %v387_v1  ;;  %505 = vmatpush.msrb.mxu0 %v386_v4  ;;  %v558_v51 = vld [vmem:[#allocation7 + $0x40] sm:$0xff]  ;;  %v556_v53 = vld [vmem:[#allocation7 + $0x30] sm:$0xff]  ;;  %v555_v54 = vld [vmem:[#allocation7 + $0x28] sm:$0xff] }
  0x88   : > { %528 = vmatpush.msrb.mxu1 %v402_v6  ;;  %472 = vmatmul.f32.vlgmr.msra.gmra.mxu2 %v300_v11  ;;  %v554_v55 = vld [vmem:[#allocation7 + $0x20] sm:$0xff]  ;;  %v553_v56 = vld [vmem:[#allocation7 + $0x18] sm:$0xff]  ;;  %v552_v57 = vld [vmem:[#allocation7 + $0x10] sm:$0xff] }
  0x89   : > { %786 = vmatpush.msrb.mxu3 %v386_v4  ;;  %506 = vmatpush.msrb.mxu0 %v385_v7  ;;  %v551_v58 = vld [vmem:[#allocation7 + $0x8] sm:$0xff]  ;;  %v550_v59 = vld [vmem:[#allocation7] sm:$0xff] }
  0x8a   : > { %529 = vmatpush.msrb.mxu1 %v401_v9  ;;  %495 = vmatmul.f32.vlgmr.msra.gmra.mxu3 %v301_v17  ;;  %v868_v61 = vld [vmem:[%s1325_s2] ss:$0 sm:$0xff] }
  0x8b   : > { %787 = vmatpush.msrb.mxu3 %v385_v7  ;;  %507 = vmatpush.msrb.mxu0 %v384_v10 }
  0x8c   : > { %530 = vmatpush.msrb.mxu1 %v400_v12  ;;  %426 = vmatmul.f32.vlgmr.msra.gmra.mxu0 %v298_v19 }
  0x8d   : > { %788 = vmatpush.msrb.mxu3 %v384_v10  ;;  %508 = vmatpush.msrb.mxu0 %v383_v13 }
  0x8e   : > { %449 = vmatmul.f32.vlgmr.msra.gmra.mxu1 %v299_v14  ;;  %570 = vmatpush.msrb.mxu2 %v565_v20 }
  0x8f   : > { %789 = vmatpush.msrb.mxu3 %v383_v13  ;;  %531 = vmatpush.msrb.mxu1 %v399_v15 }
  0x90   : > { %509 = vmatpush.msrb.mxu0 %v382_v16  ;;  %475 = vmatmul.f32.gmra.mxu2 %v306_v23  ;;  %v869_v23 = vld [vmem:[%s1327_s4] ss:$0 sm:$0xff] }
  0x91   : > { %790 = vmatpush.msrb.mxu3 %v382_v16  ;;  %532 = vmatpush.msrb.mxu1 %v398_v18 }
  0x92   : > { %510 = vmatpush.msrb.mxu0 %v381_v21  ;;  %571 = vmatpush.msrb.mxu2 %v564_v26 }
  0x93   : > { %791 = vmatpush.msrb.mxu3 %v381_v21  ;;  %533 = vmatpush.msrb.mxu1 %v397_v22 }
  0x94   : > { %511 = vmatpush.msrb.mxu0 %v380_v24  ;;  %498 = vmatmul.f32.gmra.mxu3 %v307_v29 }
  0x95   : > { %792 = vmatpush.msrb.mxu3 %v380_v24  ;;  %534 = vmatpush.msrb.mxu1 %v396_v25 }
  0x96   : > { %512 = vmatpush.msrb.mxu0 %v379_v27  ;;  %452 = vmatmul.f32.gmra.mxu1 %v305_v33 }
  0x97   : > { %793 = vmatpush.msrb.mxu3 %v379_v27  ;;  %535 = vmatpush.msrb.mxu1 %v395_v28 }
  0x98   : > { %513 = vmatpush.msrb.mxu0 %v378_v30  ;;  %572 = vmatpush.msrb.mxu2 %v563_v37 }
  0x99   : > { %794 = vmatpush.msrb.mxu3 %v378_v30  ;;  %536 = vmatpush.msrb.mxu1 %v394_v31 }
  0x9a   : > { %429 = vmatmul.f32.gmra.mxu0 %v304_v32  ;;  %573 = vmatpush.msrb.mxu2 %v562_v40 }
  0x9b   : > { %514 = vmatpush.msrb.mxu0 %v377_v34  ;;  %795 = vmatpush.msrb.mxu3 %v377_v34  ;;  %v593_v34 = vlaneseq }
  0x9c   : > { %537 = vmatpush.msrb.mxu1 %v393_v35  ;;  %574 = vmatpush.msrb.mxu2 %v561_v48 }
  0x9d   : > { %515 = vmatpush.msrb.mxu0 %v376_v36  ;;  %796 = vmatpush.msrb.mxu3 %v376_v36 }
  0x9e   : > { %538 = vmatpush.msrb.mxu1 %v392_v38  ;;  %575 = vmatpush.msrb.mxu2 %v560_v49  ;;  %v594_v38 = vand.u32 127, %v593_v34 }
  0x9f   : > { %516 = vmatpush.msrb.mxu0 %v375_v39  ;;  %797 = vmatpush.msrb.mxu3 %v375_v39 }
  0xa0   : > { %539 = vmatpush.msrb.mxu1 %v391_v41  ;;  %576 = vmatpush.msrb.mxu2 %v559_v50  ;;  %vm595_vm2 = vcmp.lt.s32.totalorder %v594_v38, 10 }
  0xa1   : > { %517 = vmatpush.msrb.mxu0 %v374_v42  ;;  %798 = vmatpush.msrb.mxu3 %v374_v42 }
  0xa2   : > { %540 = vmatpush.msrb.mxu1 %v390_v43  ;;  %518 = vmatmul.f32.vlgmr.msrb.gmra.mxu0 %v302_v44 }
  0xa3   : > { %521 = vmatmul.f32.vlgmr.msrb.gmra.mxu3 %v308_v45  ;;  %541 = vmatmul.f32.vlgmr.msrb.gmra.mxu1 %v303_v46 }
  0xa4   : > { %577 = vmatpush.msrb.mxu2 %v558_v51 }
  0xa6   : > { %578 = vmatpush.msrb.mxu2 %v557_v52 }
  0xa8   : > { %579 = vmatpush.msrb.mxu2 %v556_v53 }
  0xaa   : > { %580 = vmatpush.msrb.mxu2 %v555_v54 }
  0xab   : > { %544 = vmatmul.f32.gmra.mxu1 %v309_v47 }
  0xac   : > { %581 = vmatpush.msrb.mxu2 %v554_v55 }
  0xae   : > { %582 = vmatpush.msrb.mxu2 %v553_v56 }
  0xb0   : > { %583 = vmatpush.msrb.mxu2 %v552_v57 }
  0xb2   : > { %584 = vmatpush.msrb.mxu2 %v551_v58 }
  0xb4   : > { %585 = vmatpush.msrb.mxu2 %v550_v59 }
 0x109   : > { %v427_v62 = vpop.f32.mrf.mxu0 }
 0x10a   : > { %v428_v63 = vadd.f32 %v868_v61, %v427_v62 }
 0x10b   : > { %v450_v60 = vpop.f32.mrf.mxu1  ;;  %v473_v1 = vpop.f32.mrf.mxu2 }
 0x10c   : > { %v451_v2 = vadd.f32 %v450_v60, %v428_v63 }
 0x10d   : > { %v496_v0 = vpop.f32.mrf.mxu3 }
 0x10e   : > { %v474_v6 = vadd.f32 %v473_v1, %v451_v2 }
 0x110   : > { %v497_v10 = vadd.f32 %v496_v0, %v474_v6 }
 0x113   : > { %v453_v4 = vpop.f32.mrf.mxu1  ;;  %v476_v9 = vpop.f32.mrf.mxu2 }
 0x117   : > { %v430_v3 = vpop.f32.mrf.mxu0  ;;  %v499_v7 = vpop.f32.mrf.mxu3 }
 0x118   : > { %v431_v5 = vadd.f32 %v868_v61, %v430_v3 }
 0x11a   : > { %v454_v8 = vadd.f32 %v453_v4, %v431_v5 }
 0x11c   : > { %v477_v12 = vadd.f32 %v476_v9, %v454_v8 }
 0x11e   : > { %v500_v16 = vadd.f32 %v499_v7, %v477_v12 }
 0x11f   : > { %v519_v11 = vpop.f32.mrf.mxu0 }
 0x120   : > { %v520_v13 = vadd.f32 %v519_v11, %v497_v10  ;;  %v542_v14 = vpop.f32.mrf.mxu1 }
 0x122   : > { %v543_v15 = vadd.f32 %v542_v14, %v520_v13 }
 0x124   : > { %v548_v17 = vmax.f32 %v543_v15, 0.0 }
 0x126   : > { %v522_v18 = vpop.f32.mrf.mxu3  ;;  %586 = vmatmul.f32.vlgmr.msrb.gmra.mxu2 %v548_v17 }
 0x127   : > { %v523_v19 = vadd.f32 %v522_v18, %v500_v16 }
 0x128   : > { %v545_v20 = vpop.f32.mrf.mxu1 }
 0x129   : > { %v546_v21 = vadd.f32 %v545_v20, %v523_v19 }
 0x12b   : > { %v549_v22 = vmax.f32 %v546_v21, 0.0 }
 0x12e   : > { %589 = vmatmul.f32.gmra.mxu2 %v549_v22 }
 0x1a9   : > { %v587_v24 = vpop.f32.mrf.mxu2 }
 0x1aa   : > { %v588_v25 = vadd.f32 %v869_v23, %v587_v24 }
 0x1ac   : > { %v771_v26 = vmul.f32 -1.442695, %v588_v25 }
 0x1ae   : > { %870 = vpow2.f32 %v771_v26 }
 0x1b1   : > { %v590_v27 = vpop.f32.mrf.mxu2 }
 0x1b2   : > { %v591_v28 = vadd.f32 %v869_v23, %v590_v27 }
 0x1b4   : > { %v871_v29 = vpop.eup %870  ;;  %v772_v30 = vmul.f32 -1.442695, %v591_v28 }
 0x1b5   : > { %v602_v31 = vadd.f32 1.0, %v871_v29 }
 0x1b6   : > { %872 = vpow2.f32 %v772_v30 }
 0x1b7   : > { %874 = vrcp.f32 %v602_v31  ;;  %v615_v39 = vand.u32 2147483648, %v602_v31  ;;  %v613_v41 = vand.u32 2147483647, %v602_v31  ;;  %vm609_vm1 = vweird.f32 %v602_v31 }
 0x1b9   : > { %v616_v44 = vor.u32 1.1754944e-38, %v615_v39  ;;  %vm614_vm4 = vcmp.eq.f32.partialorder %v613_v41, 8.507059e+37 }
 0x1bc   : > { %v873_v32 = vpop.eup %872 }
 0x1bd   : > { %v875_v33 = vpop.eup %874  ;;  %v603_v35 = vadd.f32 1.0, %v873_v32 }
 0x1be   : > { %v605_v36 = vmul.f32 %v875_v33, %v602_v31  ;;  %vm610_vm0 = vweird.f32 %v875_v33 }
 0x1bf   : > { %876 = vrcp.f32 %v603_v35  ;;  %vm611_vm3 = vmor %vm609_vm1, %vm610_vm0  ;;  %v630_v50 = vand.u32 2147483648, %v603_v35  ;;  %v628_v52 = vand.u32 2147483647, %v603_v35  ;;  %vm624_vm6 = vweird.f32 %v603_v35 }
 0x1c0   : > { %v606_v37 = vsub.f32 1.0, %v605_v36 }
 0x1c1   : > { %v631_v54 = vor.u32 1.1754944e-38, %v630_v50  ;;  %vm629_vm8 = vcmp.eq.f32.partialorder %v628_v52, 8.507059e+37 }
 0x1c2   : > { %v607_v40 = vmul.f32 %v875_v33, %v606_v37 }
 0x1c4   : > { %v608_v42 = vadd.f32 %v875_v33, %v607_v40 }
 0x1c5   : > { %v877_v43 = vpop.eup %876 }
 0x1c6   : > { %v612_v45 = vsel %vm611_vm3, %v875_v33, %v608_v42  ;;  %v620_v46 = vmul.f32 %v877_v43, %v603_v35  ;;  %vm625_vm5 = vweird.f32 %v877_v43 }
 0x1c7   : > { %v617_v47 = vsel %vm614_vm4, %v616_v44, %v612_v45  ;;  %vm626_vm7 = vmor %vm624_vm6, %vm625_vm5 }
 0x1c8   : > { %v636_v48 = vsel %vm595_vm2, %v617_v47, %v588_v25  ;;  %v621_v49 = vsub.f32 1.0, %v620_v46 }
 0x1c9   : > { %638 = vst [vmem:[%s1256_s9] sm:$0xff] %v636_v48 }
 0x1ca   : > { %v622_v51 = vmul.f32 %v877_v43, %v621_v49 }
 0x1cc   : > { %v623_v53 = vadd.f32 %v877_v43, %v622_v51 }
 0x1cd   : > { %647 = sbr.rel (!%p1152_p11) target bundleno = 497 (0x1f1), region = 56 }
 0x1ce   : > { %v627_v55 = vsel %vm626_vm7, %v877_v43, %v623_v53 }
 0x1cf   : > { %v632_v56 = vsel %vm629_vm8, %v631_v54, %v627_v55 }
 0x1d0   : > { %v637_v57 = vsel %vm595_vm2, %v632_v56, %v591_v28 }
 0x1d1   : > { %639 = vst [vmem:[%s1256_s9 + $0x8] sm:$0xff] %v637_v57 }
 0x1d2   : > { %s1358_s12 = smov (!%p650_p6, %s649_s12), 2 }
 0x1d3   : > { %s775_s25 = sshll.u32 %s1358_s12, 3 }
 0x1d4   : > { %s653_s8 = ssub.s32 16, %s775_s25 }
 0x1d5   : > { %s654_s17 = sshll.u32 %s653_s8, 4 }
 0x1d6   : > { %655 = vsyncadd %s641_s26, %s654_s17  ;;  %p1270_p13 = scmp.ne.s32.totalorder %s775_s25, 0  ;;  %s782_s10 = sshll.u32 %s1121_s22, 4 }
 0x1d7   : > { %s658_s11 = scalar_lea.hbm %s1328_s5, %s782_s10  ;;  %s660_s16 = sshll.u32 %s1256_s9, 4  ;;  %s1279_s16 = int_to_ptr.vmem [resolvable:$true] %s660_s16 }
 0x1d8   : > { %s662_s29 = sshll.u32 %s658_s11, 4  ;;  %s779_s7 = sshll.u32 %s1358_s12, 7  ;;  %s1281_s29 = int_to_ptr.hbm [resolvable:$true] %s662_s29 }
 0x1d9   : > { %s977_s14 = sshra.s32 %s1279_s16, 4  ;;  %s979_s28 = sshrl.u32 %s779_s7, 4  ;;  %s978_s14 = int_to_ptr.vmem [resolvable:$true] %s977_s14 }
 0x1da   : > { %s984_s23 = scalar_lea.vmem %s978_s14, %s979_s28  ;;  %s1067_s22 = smov [#allocation8]  }
 0x1db   : > { %p985_p11 = scmp.ne.s32.totalorder %s978_s14, %s984_s23  ;;  %s988_s13 = scalar_lea.vmem %s1067_s22, 32 }
 0x1dc   : > { %p990_p1 = scmp.lt.s32.totalorder %s988_s13, %s984_s23 }
 0x1dd   : > { %p986_p7 = pnand %p985_p11, %p1270_p13 }
 0x1df   : > { %p987_p10 = pneg %p986_p7 }
 0x1e1   : > { %p992_p0 = pnand %p990_p1, %p987_p10 }
 0x1e3   : > { %995 = shalt.err (!%p992_p0)
}
 0x1e4   : > { %s996_s9 = sshra.s32 %s1281_s29, 4  ;;  %s1007_s10 = scalar_lea.hbm %s1328_s5, 40  ;;  %s997_s9 = int_to_ptr.hbm [resolvable:$true] %s996_s9 }
 0x1e5   : > { %s1003_s25 = scalar_lea.hbm %s997_s9, %s979_s28  ;;  %p1008_p8 = scmp.lt.s32.totalorder %s997_s9, %s1328_s5 }
 0x1e6   : > { %p1004_p2 = scmp.ne.s32.totalorder %s997_s9, %s1003_s25  ;;  %p1009_p9 = scmp.lt.s32.totalorder %s1007_s10, %s1003_s25 }
 0x1e8   : > { %p1005_p3 = pnand %p1004_p2, %p1270_p13  ;;  %p1010_p4 = por %p1009_p9, %p1008_p8 }
 0x1ea   : > { %p1006_p5 = pneg %p1005_p3 }
 0x1ec   : > { %p1011_p12 = pnand %p1010_p4, %p1006_p5 }
 0x1ee   : > { %1014 = shalt.err (!%p1011_p12)
}
 0x1ef   : > { %s1068_s11 = smov 128   ;;  %s1069_s14 = smov 8  }
 0x1f0   : > { %668 = dma.vmem_to_hbm [thread:$0]  (%p1270_p13), %s1279_s16, %s779_s7, %s1281_s29, %s641_s26, %s1068_s11, %s1068_s11, %s1069_s14  }
 0x1f1 PF: > { %p827_p6 = scmp.ge.s32.totalorder %s1058_s21, 2  ;;  %s677_s28 = sand.u32 1, %s1046_s18  }
 0x1f2   : > { %p1348_p11 = scmp.ne.s32.totalorder %s1337_s6, 0  ;;  %s678_s23 = scalar_lea.sflag [#allocation4], %s677_s28 }
 0x1f4   : > { %p820_p7 = pnand %p827_p6, %p1348_p11 }
 0x1f6   : > { %p821_p10 = pneg %p820_p7 }
 0x1f8   : > { %1041 = dma.done.wait (%p821_p10), %s678_s23, 256  }
 0x1f9   : > { %1043 = vsyncadd (%p821_p10), %s678_s23, 4294967040  ;;  %p19_p1 = scmp.ge.s32.totalorder %s1125_s24, 5   ;;  %s1349_s18 = smov %s1050_s19 }
 0x1fa   : > { %s1350_s19 = smov %s1054_s20  ;;  %s1351_s20 = smov %s1137_s27 }
 0x1fb   : > { %s1352_s21 = smov %s1125_s24  ;;  %21 = sbr.rel (!%p19_p1) target bundleno = 9 (0x9), region = 93 }
 0x200   :  { %684 = vsyncpa [#allocation3], 1 }
 0x201   :  { %686 = vsyncpa [#allocation3 + $0x1], 1 }
 0x202   :  { %687 = vsyncpa [#allocation6], 1 }
 0x203   :  { %688 = vsyncpa [#allocation4], 1 }
 0x204   :  { %690 = vsyncpa [#allocation4 + $0x1], 1 }

</bundles_post_ra>
